<compile_context>
chip_gen: v7x
topology: tpu7x:2x2x1
jax: 0.10.0
libtpu: 0.0.40
codegen_flags: <defaults>
</compile_context>

<pallas_src>
import functools
import math

import jax
import jax.numpy as jnp
from jax.experimental import pallas as pl
from jax.experimental.pallas import tpu as pltpu

BN_EPS = 1e-5
VMEM_TILE_BUDGET = 16 * 1024 * 1024   # working-set budget used for tile picking
VMEM_LIMIT = 32 * 1024 * 1024         # explicit scoped-VMEM limit (safe v5e/v6e/v7x)


# ----------------------------------------------------------------------------
# Helpers
# ----------------------------------------------------------------------------
def _round_up(v, m):
    return ((v + m - 1) // m) * m


def _pick_tk(pk, tm, tn, budget=VMEM_TILE_BUDGET):
    """Largest K tile (divisor of pk, multiple of 128) whose double-buffered
    working set fits the VMEM budget -> fewest grid steps."""
    n128 = pk // 128
    for g in range(1, n128 + 1):
        if n128 % g:
            continue
        tk = pk // g
        # bf16 A/B double-buffered + bf16 out/residual + f32 acc
        vmem = 4 * tk * (tm + tn) + 12 * tm * tn
        if vmem <= budget:
            return tk
    return 128


# ----------------------------------------------------------------------------
# Pallas kernels
# ----------------------------------------------------------------------------
def _mm_kernel(a_ref, b_ref, t_ref, o_ref, acc_ref, *, relu):
    """Tiled matmul with fused (+shift [+ReLU]) epilogue; BN scale is folded
    into b_ref at parameter-prep time."""
    @pl.when(pl.program_id(2) == 0)
    def _():
        acc_ref[...] = jnp.zeros_like(acc_ref)

    acc_ref[...] += jnp.dot(a_ref[...], b_ref[...],
                            preferred_element_type=jnp.float32)

    @pl.when(pl.program_id(2) == pl.num_programs(2) - 1)
    def _():
        y = acc_ref[...] + t_ref[...]
        if relu:
            y = jnp.maximum(y, 0.0)
        o_ref[...] = y.astype(o_ref.dtype)


def _mm_res_kernel(a_ref, b_ref, t_ref, r_ref, o_ref, acc_ref, *, relu):
    """Tiled matmul with fused (+shift +residual [+ReLU]) epilogue."""
    @pl.when(pl.program_id(2) == 0)
    def _():
        acc_ref[...] = jnp.zeros_like(acc_ref)

    acc_ref[...] += jnp.dot(a_ref[...], b_ref[...],
                            preferred_element_type=jnp.float32)

    @pl.when(pl.program_id(2) == pl.num_programs(2) - 1)
    def _():
        y = acc_ref[...] + t_ref[...] + r_ref[...].astype(jnp.float32)
        if relu:
            y = jnp.maximum(y, 0.0)
        o_ref[...] = y.astype(o_ref.dtype)


def _mlp_head_kernel(x_ref, w1_ref, t1_ref, w2_ref, t2_ref, w3_ref, b3_ref,
                     o_ref):
    """Global-avg-pool + fc1/bn/relu + fc2/bn/relu + fc3, all VMEM-resident.
    BN scale folded into w1/w2; linear biases folded into the shifts."""
    pooled = jnp.mean(x_ref[...].astype(jnp.float32), axis=1)        # [N, 2048]
    h = jnp.dot(pooled.astype(jnp.bfloat16), w1_ref[...],
                preferred_element_type=jnp.float32) + t1_ref[...]
    h = jnp.maximum(h, 0.0)
    # TODO(synk): Dropout(p=0.5) layers are identity under eval semantics.
    h = jnp.dot(h.astype(jnp.bfloat16), w2_ref[...],
                preferred_element_type=jnp.float32) + t2_ref[...]
    h = jnp.maximum(h, 0.0)
    o_ref[...] = jnp.dot(h.astype(jnp.bfloat16), w3_ref[...],
                         preferred_element_type=jnp.float32) + b3_ref[...]


# ----------------------------------------------------------------------------
# Fused matmul + shift (+ residual) (+ ReLU) wrapper
# ----------------------------------------------------------------------------
def matmul_shift_act(a, b_p, t_p, K, N, *, relu, residual=None):
    """out = act(a @ B + shift [+ residual]); returns bf16 [M, N].

    a: [M, K] activations; b_p: [pk, pn] pre-padded bf16 weights (BN scale
    folded in); t_p: [1, pn] f32 shift.  MXU operands bf16, f32 accumulation.
    """
    M = a.shape[0]
    pk, pn = b_p.shape

    if M >= 256:
        tm = 256
    elif M >= 128:
        tm = 128
    else:
        tm = max(16, _round_up(M, 16))
    pm = _round_up(M, tm)

    if pn >= 512 and pn % 512 == 0:
        tn = 512
    elif pn % 256 == 0:
        tn = 256
    else:
        tn = 128
    tk = _pick_tk(pk, tm, tn)

    a_p = jnp.pad(a.astype(jnp.bfloat16), ((0, pm - M), (0, pk - K)))

    in_specs = [
        pl.BlockSpec((tm, tk), lambda i, j, k: (i, k)),
        pl.BlockSpec((tk, tn), lambda i, j, k: (k, j)),
        pl.BlockSpec((1, tn), lambda i, j, k: (0, j)),
    ]
    operands = [a_p, b_p, t_p]
    if residual is not None:
        r_p = jnp.pad(residual.astype(jnp.bfloat16),
                      ((0, pm - M), (0, pn - N)))
        in_specs.append(pl.BlockSpec((tm, tn), lambda i, j, k: (i, j)))
        operands.append(r_p)
        kern = functools.partial(_mm_res_kernel, relu=relu)
    else:
        kern = functools.partial(_mm_kernel, relu=relu)

    flops = 2 * pm * pk * pn
    bytes_accessed = 2 * (pm * pk + pk * pn + 2 * pm * pn)

    out = pl.pallas_call(
        kern,
        out_shape=jax.ShapeDtypeStruct((pm, pn), jnp.bfloat16),
        grid_spec=pltpu.PrefetchScalarGridSpec(
            num_scalar_prefetch=0,
            grid=(pm // tm, pn // tn, pk // tk),
            in_specs=in_specs,
            out_specs=pl.BlockSpec((tm, tn), lambda i, j, k: (i, j)),
            scratch_shapes=[pltpu.VMEM((tm, tn), jnp.float32)],
        ),
        compiler_params=pltpu.CompilerParams(
            dimension_semantics=("parallel", "parallel", "arbitrary"),
            vmem_limit_bytes=VMEM_LIMIT),
        cost_estimate=pl.CostEstimate(flops=flops, transcendentals=0,
                                      bytes_accessed=bytes_accessed),
    )(*operands)
    return out[:M, :N]


# ----------------------------------------------------------------------------
# Layer wrappers (JAX glue around the Pallas kernels)
# ----------------------------------------------------------------------------
def _im2col(x, kd, kh, kw, *, stride, dilation, padding):
    """x:[N,D,H,W,Cin] -> (A:[N*Do*Ho*Wo, kd*kh*kw*Cin], out spatial dims)."""
    N, D, H, W, Cin = x.shape
    s, dil, p = stride, dilation, padding
    xp = jnp.pad(x, ((0, 0), (p, p), (p, p), (p, p), (0, 0))) if p else x
    Do = (D + 2 * p - dil * (kd - 1) - 1) // s + 1
    Ho = (H + 2 * p - dil * (kh - 1) - 1) // s + 1
    Wo = (W + 2 * p - dil * (kw - 1) - 1) // s + 1
    taps = []
    for i in range(kd):
        for j in range(kh):
            for l in range(kw):
                taps.append(xp[:,
                               i * dil: i * dil + s * (Do - 1) + 1: s,
                               j * dil: j * dil + s * (Ho - 1) + 1: s,
                               l * dil: l * dil + s * (Wo - 1) + 1: s, :])
    if len(taps) == 1:
        patches = taps[0]                        # 1x1x1 conv: no concat needed
    else:
        patches = jnp.concatenate(taps, axis=-1)  # [N,Do,Ho,Wo,K3*Cin]
    A = patches.reshape(N * Do * Ho * Wo, kd * kh * kw * Cin)
    return A, (N, Do, Ho, Wo)
    # TODO(synk): for 3x3x3 convs the taps are still materialized (bf16) in HBM;
    # folding the tap axis into the matmul K grid with manual DMA would remove
    # this for large volumes.


def conv_bn(x, cp, *, relu=False, residual=None):
    """conv3d -> BN -> (+residual) -> (ReLU), fused into one matmul call."""
    kd, kh, kw = cp["k"]
    A, (N, Do, Ho, Wo) = _im2col(x, kd, kh, kw, stride=cp["stride"],
                                 dilation=cp["dilation"], padding=cp["padding"])
    r2 = None if residual is None else residual.reshape(-1, cp["N"])
    y = matmul_shift_act(A, cp["B"], cp["t"], cp["K"], cp["N"],
                         relu=relu, residual=r2)
    return y.reshape(N, Do, Ho, Wo, cp["N"])


def maxpool3d(x, *, k=3, stride=2, pad=1):
    """Max-pool via a tree of jnp.maximum over strided views (XLA fuses this
    into one elementwise pass; avoids a 27x HBM tap materialization)."""
    N, D, H, W, C = x.shape
    xp = jnp.pad(x, ((0, 0), (pad, pad), (pad, pad), (pad, pad), (0, 0)),
                 constant_values=-jnp.inf)
    Do = (D + 2 * pad - k) // stride + 1
    Ho = (H + 2 * pad - k) // stride + 1
    Wo = (W + 2 * pad - k) // stride + 1
    out = None
    for i in range(k):
        for j in range(k):
            for l in range(k):
                t = xp[:,
                       i: i + stride * (Do - 1) + 1: stride,
                       j: j + stride * (Ho - 1) + 1: stride,
                       l: l + stride * (Wo - 1) + 1: stride, :]
                out = t if out is None else jnp.maximum(out, t)
    return out


def mlp_head(feat, mp):
    """AdaptiveAvgPool3d((1,1,1)) + Flatten + fc1/bn/relu + fc2/bn/relu + fc3
    in a single Pallas call (all weights VMEM-resident)."""
    N, D, H, W, C = feat.shape
    S = D * H * W
    x3 = feat.reshape(N, S, C)
    pn_rows = max(8, _round_up(N, 8))
    x3 = jnp.pad(x3, ((0, pn_rows - N), (0, 0), (0, 0)))
    out = pl.pallas_call(
        _mlp_head_kernel,
        out_shape=jax.ShapeDtypeStruct((pn_rows, mp["w3"].shape[1]),
                                       jnp.float32),
        compiler_params=pltpu.CompilerParams(vmem_limit_bytes=VMEM_LIMIT),
    )(x3, mp["w1"], mp["t1"], mp["w2"], mp["t2"], mp["w3"], mp["b3"])
    return out[:N, :mp["num_classes"]]


# ----------------------------------------------------------------------------
# Parameter construction (deterministic, synthetic — mirrors __init__ shapes)
# ----------------------------------------------------------------------------
def kaiming_conv(key, kd, kh, kw, cin, cout):
    fan_out = cout * kd * kh * kw
    std = math.sqrt(2.0 / fan_out)
    return jax.random.normal(key, (kd, kh, kw, cin, cout), jnp.float32) * std


def bn_params(c):
    return {"gamma": jnp.ones((c,), jnp.float32),
            "beta": jnp.zeros((c,), jnp.float32),
            "mean": jnp.zeros((c,), jnp.float32),
            "var": jnp.ones((c,), jnp.float32)}


def bn_scale_shift(bn):
    scale = bn["gamma"] / jnp.sqrt(bn["var"] + BN_EPS)
    shift = bn["beta"] - bn["mean"] * scale
    return scale, shift


def make_bottleneck_params(key, inplanes, planes, stride, dilation, downsample):
    k1, k2, k3, k4 = jax.random.split(key, 4)
    p = {
        "w1": kaiming_conv(k1, 1, 1, 1, inplanes, planes),
        "bn1": bn_params(planes),
        "w2": kaiming_conv(k2, 3, 3, 3, planes, planes),
        "bn2": bn_params(planes),
        "w3": kaiming_conv(k3, 1, 1, 1, planes, planes * 4),
        "bn3": bn_params(planes * 4),
        "stride": stride,
        "dilation": dilation,
    }
    if downsample:
        p["wd"] = kaiming_conv(k4, 1, 1, 1, inplanes, planes * 4)
        p["bnd"] = bn_params(planes * 4)
    return p


def make_resnet50_params(key):
    keys = list(jax.random.split(key, 64))
    ki = iter(keys)
    params = {"conv1": kaiming_conv(next(ki), 7, 7, 7, 1, 64),
              "bn1": bn_params(64)}
    # (planes, blocks, stride, dilation) for layer1..layer4 of ResNet-50
    cfg = [(64, 3, 1, 1), (128, 4, 2, 1), (256, 6, 1, 2), (512, 3, 1, 4)]
    inplanes = 64
    layers = []
    for planes, blocks, stride, dilation in cfg:
        blks = []
        downsample = (stride != 1) or (inplanes != planes * 4)
        blks.append(make_bottleneck_params(next(ki), inplanes, planes,
                                           stride, dilation, downsample))
        inplanes = planes * 4
        for _ in range(1, blocks):
            blks.append(make_bottleneck_params(next(ki), inplanes, planes,
                                               1, dilation, False))
        layers.append(blks)
    params["layers"] = layers
    return params


def make_mlp_params(key, num_classes=1):
    ks = jax.random.split(key, 6)

    def lin(kw, kb, fin, fout):
        lim = 1.0 / math.sqrt(fin)
        w = jax.random.normal(kw, (fin, fout), jnp.float32) * lim
        b = jax.random.uniform(kb, (fout,), jnp.float32, -lim, lim)
        return w, b

    fc1_w, fc1_b = lin(ks[0], ks[1], 2048, 256)
    fc2_w, fc2_b = lin(ks[2], ks[3], 256, 128)
    fc3_w, fc3_b = lin(ks[4], ks[5], 128, num_classes)
    return {"fc1_w": fc1_w, "fc1_b": fc1_b, "bn_fc1": bn_params(256),
            "fc2_w": fc2_w, "fc2_b": fc2_b, "bn_fc2": bn_params(128),
            "fc3_w": fc3_w, "fc3_b": fc3_b}


# ----------------------------------------------------------------------------
# One-time inference parameter prep (BN folding, bf16 cast, reshape, pad)
# ----------------------------------------------------------------------------
def prep_conv(w, bn, *, stride, dilation, padding):
    kd, kh, kw, cin, cout = w.shape
    K = kd * kh * kw * cin
    scale, shift = bn_scale_shift(bn)
    B = w.reshape(K, cout) * scale[None, :]          # fold BN scale into weight
    pk, pn = _round_up(K, 128), _round_up(cout, 128)
    B = jnp.pad(B, ((0, pk - K), (0, pn - cout))).astype(jnp.bfloat16)
    t = jnp.pad(shift.reshape(1, cout),
                ((0, 0), (0, pn - cout))).astype(jnp.float32)
    return {"B": B, "t": t, "K": K, "N": cout, "k": (kd, kh, kw),
            "stride": stride, "dilation": dilation, "padding": padding}


def prep_mlp(mlp):
    s1, sh1 = bn_scale_shift(mlp["bn_fc1"])
    w1 = (mlp["fc1_w"] * s1[None, :]).astype(jnp.bfloat16)
    t1 = (sh1 + mlp["fc1_b"] * s1).reshape(1, -1).astype(jnp.float32)
    s2, sh2 = bn_scale_shift(mlp["bn_fc2"])
    w2 = (mlp["fc2_w"] * s2[None, :]).astype(jnp.bfloat16)
    t2 = (sh2 + mlp["fc2_b"] * s2).reshape(1, -1).astype(jnp.float32)
    nc = mlp["fc3_w"].shape[1]
    pnc = _round_up(nc, 128)
    w3 = jnp.pad(mlp["fc3_w"], ((0, 0), (0, pnc - nc))).astype(jnp.bfloat16)
    b3 = jnp.pad(mlp["fc3_b"].reshape(1, -1),
                 ((0, 0), (0, pnc - nc))).astype(jnp.float32)
    return {"w1": w1, "t1": t1, "w2": w2, "t2": t2, "w3": w3, "b3": b3,
            "num_classes": nc}


def prepare_params(raw):
    r = raw["resnet"]
    prep = {"conv1": prep_conv(r["conv1"], r["bn1"], stride=2, dilation=1,
                               padding=3),
            "layers": []}
    for layer in r["layers"]:
        blks = []
        for p in layer:
            b = {"c1": prep_conv(p["w1"], p["bn1"], stride=1, dilation=1,
                                 padding=0),
                 "c2": prep_conv(p["w2"], p["bn2"], stride=p["stride"],
                                 dilation=p["dilation"], padding=p["dilation"]),
                 "c3": prep_conv(p["w3"], p["bn3"], stride=1, dilation=1,
                                 padding=0)}
            if "wd" in p:
                b["cd"] = prep_conv(p["wd"], p["bnd"], stride=p["stride"],
                                    dilation=1, padding=0)
            blks.append(b)
        prep["layers"].append(blks)
    return {"resnet": prep, "mlp": prep_mlp(raw["mlp"])}


# ----------------------------------------------------------------------------
# Forward pass
# ----------------------------------------------------------------------------
def bottleneck_forward(x, pb):
    out = conv_bn(x, pb["c1"], relu=True)
    out = conv_bn(out, pb["c2"], relu=True)
    if "cd" in pb:
        residual = conv_bn(x, pb["cd"], relu=False)
    else:
        residual = x
    # conv3 -> bn3 -> (+ residual) -> ReLU, fused in one matmul epilogue
    out = conv_bn(out, pb["c3"], relu=True, residual=residual)
    return out


def resnet_backbone_forward(prep, x):
    # conv1 (k=7, stride 2, pad 3) -> bn -> relu -> maxpool(3, stride 2, pad 1)
    x = conv_bn(x, prep["conv1"], relu=True)
    x = maxpool3d(x)
    for layer in prep["layers"]:
        for blk in layer:
            x = bottleneck_forward(x, blk)
    return x  # classifier is Identity in ResNetMLP -> return feature map


def resnet_mlp_forward(prep, x_ncdhw):
    # layout: NCDHW (PyTorch) -> NDHWC (TPU lanes on channels); bf16 activations
    x = jnp.transpose(x_ncdhw, (0, 2, 3, 4, 1)).astype(jnp.bfloat16)
    feat = resnet_backbone_forward(prep["resnet"], x)      # [N,d,h,w,2048] bf16
    return mlp_head(feat, prep["mlp"])                     # [N, num_classes] f32


# ----------------------------------------------------------------------------
# Main
# ----------------------------------------------------------------------------
if __name__ == "__main__":
    num_classes = 1
    kr, km = jax.random.split(jax.random.PRNGKey(42))
    raw_params = {"resnet": make_resnet50_params(kr),
                  "mlp": make_mlp_params(km, num_classes=num_classes)}
    params = prepare_params(raw_params)        # one-time BN-fold / bf16 / pad

    # Small synthetic input consistent with the module: batch=2, 1 channel,
    # 16^3 volume (PyTorch NCDHW layout).
    x = jax.random.normal(jax.random.PRNGKey(0), (2, 1, 16, 16, 16),
                          jnp.float32)

    out = resnet_mlp_forward(params, x)
    out = jax.block_until_ready(out)
    assert out.shape == (2, num_classes)
    assert bool(jnp.all(jnp.isfinite(out)))
    print("KERNEL_OK")
</pallas_src>

<mosaic_0001>
module attributes {stable_mosaic.version = 11 : i64} {
  func.func @_mm_kernel(%arg0: i32, %arg1: i32, %arg2: i32, %arg3: memref<256x384xbf16, #tpu.memory_space<vmem>>, %arg4: memref<384x128xbf16, #tpu.memory_space<vmem>>, %arg5: memref<1x128xf32, #tpu.memory_space<vmem>>, %arg6: memref<256x128xbf16, #tpu.memory_space<vmem>>, %arg7: memref<256x128xf32, #tpu.memory_space<vmem>>) attributes {dimension_semantics = [#tpu.dimension_semantics<parallel>, #tpu.dimension_semantics<parallel>, #tpu.dimension_semantics<arbitrary>], iteration_bounds = array<i64: 4, 1, 1>, scalar_prefetch = 0 : i64, scratch_operands = 1 : i64, tpu.core_type = #tpu.core_type<tc>, window_params = [{transform_indices = @transform_0, window_bounds = array<i64: 256, 384>}, {transform_indices = @transform_1, window_bounds = array<i64: 384, 128>}, {transform_indices = @transform_2, window_bounds = array<i64: 1, 128>}, {transform_indices = @transform_3, window_bounds = array<i64: 256, 128>}]} {
    %c0_i32 = arith.constant 0 : i32
    %0 = arith.cmpi eq, %arg2, %c0_i32 : i32
    %1 = arith.extui %0 : i1 to i32
    %c0_i32_0 = arith.constant 0 : i32
    %2 = arith.cmpi ne, %1, %c0_i32_0 : i32
    scf.if %2 {
      %cst_10 = arith.constant 0.000000e+00 : f32
      %12 = vector.broadcast %cst_10 : f32 to vector<256x128xf32>
      %c0_11 = arith.constant 0 : index
      %c0_12 = arith.constant 0 : index
      %13 = vector.load %arg7[%c0_11, %c0_12] : memref<256x128xf32, #tpu.memory_space<vmem>>, vector<256x128xf32>
      tpu.vector_store %arg7[%c0_11, %c0_12], %12 {strides = array<i32>} : memref<256x128xf32, #tpu.memory_space<vmem>>, vector<256x128xf32>,
    } else {
    }
    %c0 = arith.constant 0 : index
    %c0_1 = arith.constant 0 : index
    %3 = vector.load %arg7[%c0, %c0_1] : memref<256x128xf32, #tpu.memory_space<vmem>>, vector<256x128xf32>
    %c0_2 = arith.constant 0 : index
    %c0_3 = arith.constant 0 : index
    %4 = vector.load %arg3[%c0_2, %c0_3] : memref<256x384xbf16, #tpu.memory_space<vmem>>, vector<256x384xbf16>
    %c0_4 = arith.constant 0 : index
    %c0_5 = arith.constant 0 : index
    %5 = vector.load %arg4[%c0_4, %c0_5] : memref<384x128xbf16, #tpu.memory_space<vmem>>, vector<384x128xbf16>
    %cst = arith.constant dense<0.000000e+00> : vector<256x128xf32>
    %6 = tpu.matmul %4, %5, %cst {dimension_numbers = #tpu.dot_dimension_numbers<[1], [0], [0], [1], [0, 0, 1, 1], [], []>} : vector<256x384xbf16>, vector<384x128xbf16>, vector<256x128xf32> -> vector<256x128xf32>
    %7 = arith.addf %3, %6 : vector<256x128xf32>
    %c0_6 = arith.constant 0 : index
    %c0_7 = arith.constant 0 : index
    %8 = vector.load %arg7[%c0_6, %c0_7] : memref<256x128xf32, #tpu.memory_space<vmem>>, vector<256x128xf32>
    tpu.vector_store %arg7[%c0_6, %c0_7], %7 {strides = array<i32>} : memref<256x128xf32, #tpu.memory_space<vmem>>, vector<256x128xf32>,
    %c0_i32_8 = arith.constant 0 : i32
    %9 = arith.cmpi eq, %arg2, %c0_i32_8 : i32
    %10 = arith.extui %9 : i1 to i32
    %c0_i32_9 = arith.constant 0 : i32
    %11 = arith.cmpi ne, %10, %c0_i32_9 : i32
    scf.if %11 {
      %c0_10 = arith.constant 0 : index
      %c0_11 = arith.constant 0 : index
      %12 = vector.load %arg7[%c0_10, %c0_11] : memref<256x128xf32, #tpu.memory_space<vmem>>, vector<256x128xf32>
      %c0_12 = arith.constant 0 : index
      %c0_13 = arith.constant 0 : index
      %13 = vector.load %arg5[%c0_12, %c0_13] : memref<1x128xf32, #tpu.memory_space<vmem>>, vector<1x128xf32>
      %14 = vector.broadcast %13 : vector<1x128xf32> to vector<256x128xf32>
      %15 = arith.addf %12, %14 : vector<256x128xf32>
      %cst_14 = arith.constant 0.000000e+00 : f32
      %16 = vector.broadcast %cst_14 : f32 to vector<256x128xf32>
      %17 = arith.maximumf %15, %16 : vector<256x128xf32>
      %18 = arith.truncf %17 : vector<256x128xf32> to vector<256x128xbf16>
      %c0_15 = arith.constant 0 : index
      %c0_16 = arith.constant 0 : index
      %19 = vector.load %arg6[%c0_15, %c0_16] : memref<256x128xbf16, #tpu.memory_space<vmem>>, vector<256x128xbf16>
      tpu.vector_store %arg6[%c0_15, %c0_16], %18 {strides = array<i32>} : memref<256x128xbf16, #tpu.memory_space<vmem>>, vector<256x128xbf16>,
    } else {
    }
    return
  }
  func.func @transform_0(%arg0: i32, %arg1: i32, %arg2: i32) -> (i32, i32) {
    %c0_i32 = arith.constant 0 : i32
    return %arg0, %arg2 : i32, i32
  }
  func.func @transform_1(%arg0: i32, %arg1: i32, %arg2: i32) -> (i32, i32) {
    %c0_i32 = arith.constant 0 : i32
    return %arg2, %arg1 : i32, i32
  }
  func.func @transform_2(%arg0: i32, %arg1: i32, %arg2: i32) -> (i32, i32) {
    %c0_i32 = arith.constant 0 : i32
    %c0_i32_0 = arith.constant 0 : i32
    return %c0_i32, %arg1 : i32, i32
  }
  func.func @transform_3(%arg0: i32, %arg1: i32, %arg2: i32) -> (i32, i32) {
    %c0_i32 = arith.constant 0 : i32
    return %arg0, %arg1 : i32, i32
  }
}

</mosaic_0001>

<bundles_post_ra>
// kernel: tpu_custom_call.1
= control target key start
LH: loop header
LB: loop body
LE: loop exit
PB: predicated region body
PF: predicated region fallthrough
CT: control target
= control target key end

     0   :  { %8 = vsyncpa [#allocation4], 0  ;;  %s2765_s0 = inlined_call_operand.hbm [shape: bf16[1024,384], index: 0, kind: input, shape index: {}]   ;;  %s2766_s1 = inlined_call_operand.hbm [shape: bf16[384,128], index: 1, kind: input, shape index: {}]   ;;  %s2767_s2 = inlined_call_operand.vmem [shape: f32[1,128], index: 2, kind: input, shape index: {}]   ;;  %s2768_s3 = inlined_call_operand.hbm [shape: bf16[1024,128], index: 3, kind: output, shape index: {}]  }
   0x1   :  { %10 = vsyncpa [#allocation4 + $0x1], 0 }
   0x2   :  { %11 = vsyncpa [#allocation7], 0 }
   0x3   :  { %12 = vsyncpa [#allocation5], 0 }
   0x4   :  { %14 = vsyncpa [#allocation5 + $0x1], 0  ;;  %s2417_s12 = smov 0   ;;  %s2419_s13 = smov 0  }
   0x5   :  { %s2421_s14 = smov 0   ;;  %s2423_s15 = smov 0  }
   0x6   :  { %s2425_s16 = smov 0   ;;  %s2427_s17 = smov 0  }
   0x7 LB: > { %s1622_s18 = sadd.s32 4294967295, %s2386_s17   ;;  %s1623_s19 = sadd.s32 4294967294, %s2386_s17   ;;  %s2386_s17 = sphi %s2427_s17, %s20_s17   ;;  %s2382_s16 = sphi %s2425_s16, %s2790_s16   ;;  %s2378_s15 = sphi %s2423_s15, %s2789_s15   ;;  %s2374_s14 = sphi %s2421_s14, %s2788_s14   ;;  %s2370_s13 = sphi %s2419_s13, %s2787_s13   ;;  %s2366_s12 = sphi %s2417_s12, %s2786_s12  }
   0x8   : > { %p61_p0 = scmp.ne.s32.totalorder %s2370_s13, %s2366_s12  ;;  %p2451_p1 = scmp.eq.s32.totalorder %s1622_s18, 0 }
   0x9   : > { %p2455_p2 = scmp.eq.s32.totalorder %s1622_s18, 3  ;;  %p147_p3 = scmp.eq.s32.totalorder %s1623_s19, 3 }
   0xa   : > { %s2773_s20 = scalar_select %p2451_p1, 1, 0 }
   0xb   : > { %s2774_s21 = scalar_select %p2455_p2, 1, 0 }
   0xc   : > { %p2461_p4 = por %p2451_p1, %p61_p0  ;;  %p1624_p5 = scmp.ge.s32.totalorder %s2386_s17, 1 }
   0xd   : > { %p2466_p6 = por %p147_p3, %p61_p0  ;;  %p154_p7 = scmp.lt.s32.totalorder %s2386_s17, 5 }
   0xe   : > { %s2775_s22 = scalar_select %p2461_p4, 1, 0 }
   0xf   : > { %s2776_s23 = scalar_select %p2466_p6, 1, 0 }
  0x10   : > { %p2471_p8 = pnand %p1624_p5, %p154_p7  ;;  %s2388_s25 = smov [#allocation6]  }
  0x11   : > { %s170_s26 = sshll.u32 %s2388_s25, 4  ;;  %s39_s28 = sadd.s32 1, %s2382_s16  ;;  %s171_s26 = int_to_ptr.vmem [resolvable:$true] %s170_s26 }
  0x12   : > { %s2777_s24 = scalar_select %p2471_p8, 1, 0 }
  0x13   : > { %p2083_p9 = pneg %p2471_p8  ;;  %s2242_s4 = scalar_lea.hbm %s2766_s1, 3072 }
  0x14   : > { %p2243_p11 = scmp.ne.s32.totalorder %s2766_s1, %s2242_s4  ;;  %p2249_p3 = scmp.lt.u32.totalorder %s2242_s4, %s2766_s1 }
  0x15   : > { %p2479_p10 = pnand %p2083_p9, %p2451_p1 }
  0x17   : > { %p2244_p12 = pneg %p2479_p10 }
  0x19   : > { %p2245_p13 = pnand %p2244_p12, %p2243_p11 }
  0x1b   : > { %p2246_p0 = pneg %p2245_p13 }
  0x1d   : > { %p2251_p5 = pnand %p2249_p3, %p2246_p0 }
  0x1f   : > { %2254 = shalt.err (!%p2251_p5)
}
  0x20   : > { %s2255_s9 = scalar_lea.vmem %s171_s26, 3072  ;;  %p2263_p1 = scmp.lt.s32.totalorder %s171_s26, %s171_s26 }
  0x21   : > { %p2256_p7 = scmp.ne.s32.totalorder %s171_s26, %s2255_s9  ;;  %p2264_p4 = scmp.lt.s32.totalorder %s2255_s9, %s2255_s9 }
  0x23   : > { %p2258_p9 = pnand %p2256_p7, %p2244_p12  ;;  %p2265_p8 = por %p2264_p4, %p2263_p1 }
  0x25   : > { %p2259_p6 = pneg %p2258_p9 }
  0x27   : > { %p2266_p2 = pnand %p2265_p8, %p2259_p6 }
  0x29   : > { %2269 = shalt.err (!%p2266_p2)
}
  0x2a   : > { %s2389_s10 = smov 64   ;;  %s2390_s11 = smov 4  }
  0x2b   : > { %2086 = dma.hbm_to_vmem [thread:$0]  (!%p2479_p10), %s2766_s1, 3072, %s171_s26, [#allocation7], %s2389_s10, %s2389_s10, %s2390_s11  }
  0x2c   : > { %p41_p1 = scmp.ge.s32.totalorder %s39_s28, 4  ;;  %s48_s25 = sadd.s32 1, %s2374_s14 }
  0x2d   : > { %p55_p2 = scmp.ne.s32.totalorder %s2374_s14, %s2370_s13  ;;  %p56_p4 = scmp.eq.s32.totalorder %s2386_s17, 0 }
  0x2e   : > { %s2792_s28 = smov (%p41_p1, %s39_s28), 0  ;;  %p2779_p8 = scmp.ne.s32.totalorder %s2774_s21, 0 }
  0x2f   : > { %p57_p6 = por %p56_p4, %p55_p2  ;;  %s43_s30 = ssub.s32 %s2382_s16, %s2792_s28 }
  0x30   : > { %p2508_p11 = por %p2779_p8, %p55_p2  ;;  %p2096_p12 = scmp.lt.s32.totalorder %s2386_s17, 4 }
  0x31   : > { %p46_p13 = scmp.eq.s32.totalorder %s43_s30, 0  ;;  %s190_s27 = sand.u32 1, %s2374_s14  }
  0x32   : > { %s2072_s4 = smul.u32 384, %s190_s27  ;;  %p2520_p10 = pnand %p2096_p12, %p57_p6 }
  0x33   : > { %s2517_s5 = scalar_select %p46_p13, %s2374_s14, %s48_s25  }
  0x34   : > { %s2073_s26 = smul.u32 6144, %s2382_s16  ;;  %s194_s6 = scalar_lea.vmem [#allocation3], %s2072_s4 }
  0x35   : > { %s204_s7 = sshll.u32 %s194_s6, 4  ;;  %s2531_s11 = scalar_lea.sflag [#allocation4], %s190_s27  ;;  %s2529_s7 = int_to_ptr.vmem [resolvable:$true] %s204_s7 }
  0x36   : > { %s2527_s10 = scalar_lea.hbm %s2765_s0, %s2073_s26  ;;  %p2272_p3 = pneg %p2520_p10 }
  0x37   : > { %s2270_s18 = scalar_lea.hbm %s2527_s10, 6144  ;;  %s2275_s30 = scalar_lea.hbm %s2765_s0, 24576 }
  0x38   : > { %p2271_p0 = scmp.ne.s32.totalorder %s2527_s10, %s2270_s18  ;;  %p2276_p9 = scmp.lt.u32.totalorder %s2527_s10, %s2765_s0 }
  0x39   : > { %p2277_p1 = scmp.lt.u32.totalorder %s2275_s30, %s2270_s18  ;;  %p2279_p4 = scmp.lt.u32.totalorder %s2270_s18, %s2527_s10 }
  0x3a   : > { %p2273_p5 = pnand %p2272_p3, %p2271_p0 }
  0x3b   : > { %p2278_p2 = por %p2277_p1, %p2276_p9 }
  0x3c   : > { %p2274_p7 = pneg %p2273_p5 }
  0x3d   : > { %p2280_p6 = por %p2279_p4, %p2278_p2 }
  0x3f   : > { %p2281_p8 = pnand %p2280_p6, %p2274_p7 }
  0x41   : > { %2284 = shalt.err (!%p2281_p8)
}
  0x42   : > { %s2285_s27 = scalar_lea.vmem %s2529_s7, 6144  ;;  %s2391_s6 = smov [#allocation3]  }
  0x43   : > { %p2286_p12 = scmp.ne.s32.totalorder %s2529_s7, %s2285_s27  ;;  %s2290_s9 = sshll.u32 %s2391_s6, 4  ;;  %s2291_s9 = int_to_ptr.vmem [resolvable:$false] %s2290_s9 }
  0x44   : > { %s2292_s21 = scalar_lea.vmem %s2291_s9, 12288  ;;  %p2293_p5 = scmp.lt.s32.totalorder %s2529_s7, %s2291_s9 }
  0x45   : > { %p2288_p13 = pnand %p2286_p12, %p2272_p3  ;;  %p2294_p9 = scmp.lt.s32.totalorder %s2292_s21, %s2285_s27 }
  0x47   : > { %p2289_p0 = pneg %p2288_p13  ;;  %p2295_p1 = por %p2294_p9, %p2293_p5 }
  0x49   : > { %p2296_p2 = pnand %p2295_p1, %p2289_p0 }
  0x4b   : > { %2299 = shalt.err (!%p2296_p2)
}
  0x4c   : > { %s2392_s18 = smov 192   ;;  %s2393_s19 = smov 12  }
  0x4d   : > { %2090 = dma.hbm_to_vmem [thread:$0]  (!%p2520_p10), %s2527_s10, 6144, %s2529_s7, %s2531_s11, %s2392_s18, %s2392_s18, %s2393_s19  }
  0x4e   : > { %p2782_p3 = scmp.ne.s32.totalorder %s2777_s24, 0 }
  0x4f   : > { %s2562_s25 = sand.u32 (!%p2782_p3), 1, %s2370_s13   ;;  %p2783_p7 = scmp.ne.s32.totalorder (!%p2782_p3), %s2775_s22, 0 }
  0x50   : > { %216 = sbr.rel (%p2782_p3) target bundleno = 452 (0x1c4), region = 32  ;;  %s219_s4 = scalar_lea.sflag (!%p2782_p3), [#allocation4], %s2562_s25 }
  0x51   : > { %s2074_s30 = smul.u32 (!%p2782_p3), 384, %s2562_s25 }
  0x53   : > { %s2566_s26 = scalar_lea.vmem (!%p2782_p3), [#allocation3], %s2074_s30 }
  0x57   : > { %2353 = dma.done.wait (%p2783_p7), %s219_s4, 6144  }
  0x58   : > { %2355 = vsyncadd (%p2783_p7), %s219_s4, 4294961152  ;;  %p2784_p10 = scmp.ne.s32.totalorder %s2773_s20, 0 }
  0x5a   : > { %2357 = dma.done.wait (%p2784_p10), [#allocation7], 3072  }
  0x5b   : > { %2359 = vsyncadd (%p2784_p10), [#allocation7], 4294964224  ;;  %v2154_v0 = vld [vmem:[#allocation6 + $0x40] sm:$0xff]   ;;  %v2156_v2 = vld [vmem:[#allocation6 + $0x48] sm:$0xff]   ;;  %s1633_s24 = sshll.u32 %s2562_s25, 7  ;;  %s1776_s8 = sshll.u32 %s2378_s15, 11 }
  0x5c   : > { %v2155_v1 = vld [vmem:[#allocation6] sm:$0xff]   ;;  %1872 = vmatprep.subr.bf16.mxu0 %v2154_v0  ;;  %2056 = vmatprep.subr.bf16.mxu1 %v2154_v0  ;;  %v2157_v3 = vld [vmem:[#allocation6 + $0x8] sm:$0xff]   ;;  %v2158_v4 = vld [vmem:[#allocation6 + $0x50] sm:$0xff]   ;;  %s2650_s7 = scalar_lea.vmem [#allocation8], %s1633_s24  ;;  %s2713_s6 = scalar_lea.hbm %s2768_s3, %s1776_s8 }
  0x5d   : > { %1873 = vmatpush3.bf16.msra.mxu0 %v2155_v1  ;;  %2064 = vmatpush3.bf16.msra.mxu1 %v2155_v1  ;;  %v2159_v5 = vld [vmem:[#allocation6 + $0x10] sm:$0xff]   ;;  %v2160_v6 = vld [vmem:[#allocation6 + $0x58] sm:$0xff]   ;;  %v2162_v8 = vld [vmem:[#allocation6 + $0x60] sm:$0xff]   ;;  %s1507_s10 = sshll.u32 %s2650_s7, 4  ;;  %s1493_s15 = scalar_lea.sflag [#allocation5], %s2562_s25  ;;  %s2715_s10 = int_to_ptr.vmem [resolvable:$true] %s1507_s10 }
  0x5e   : > { %1874 = vmatprep.subr.bf16.mxu0 %v2156_v2  ;;  %2057 = vmatprep.subr.bf16.mxu1 %v2156_v2  ;;  %v2161_v7 = vld [vmem:[#allocation6 + $0x18] sm:$0xff]   ;;  %v2163_v9 = vld [vmem:[#allocation6 + $0x20] sm:$0xff]   ;;  %v2164_v10 = vld [vmem:[#allocation6 + $0x68] sm:$0xff]   ;;  %s2300_s9 = scalar_lea.vmem %s2715_s10, 2048  ;;  %s2394_s21 = smov [#allocation8]  }
  0x5f   : > { %v2172_v11 = vld [vmem:[%s2566_s26 + $0x4] ss:$12 sps:$4 sm:$0xff]   ;;  %v2165_v13 = vld [vmem:[#allocation6 + $0x28] sm:$0xff]   ;;  %v2168_v16 = vld [vmem:[#allocation6 + $0x78] sm:$0xff]   ;;  %p2301_p4 = scmp.ne.s32.totalorder %s2715_s10, %s2300_s9  ;;  %s2304_s18 = sshll.u32 %s2394_s21, 4  ;;  %s2305_s18 = int_to_ptr.vmem [resolvable:$false] %s2304_s18 }
  0x60   : > { %v2175_v12 = vld [vmem:[%s2566_s26 + $0x124] ss:$12 sps:$4 sm:$0xff]   ;;  %872 = vmatprep.mubr.bf16.mxu0 %v2172_v11  ;;  %v2169_v17 = vld [vmem:[#allocation6 + $0x38] sm:$0xff]   ;;  %v2170_v19 = vld [vmem:[%s2566_s26] ss:$12 sps:$4 sm:$0xff]   ;;  %s2306_s19 = scalar_lea.vmem %s2305_s18, 4096  ;;  %p2307_p12 = scmp.lt.s32.totalorder %s2715_s10, %s2305_s18 }
  0x61   : > { %1875 = vmatpush3.bf16.msra.mxu0 %v2157_v3  ;;  %2065 = vmatpush3.bf16.msra.mxu1 %v2157_v3  ;;  %v2166_v14 = vld [vmem:[#allocation6 + $0x70] sm:$0xff]   ;;  %v2176_v18 = vld [vmem:[#allocation6 + $0x80] sm:$0xff]   ;;  %v2178_v21 = vld [vmem:[%s2566_s26 + $0x1c] ss:$12 sps:$4 sm:$0xff]   ;;  %p2302_p6 = pnand %p2301_p4, %p2508_p11  ;;  %p2308_p13 = scmp.lt.s32.totalorder %s2306_s19, %s2300_s9 }
  0x62   : > { %1876 = vmatprep.subr.bf16.mxu0 %v2158_v4  ;;  %2058 = vmatprep.subr.bf16.mxu1 %v2158_v4  ;;  %v2167_v15 = vld [vmem:[#allocation6 + $0x30] sm:$0xff]   ;;  %v2173_v20 = vld [vmem:[%s2566_s26 + $0x120] ss:$12 sps:$4 sm:$0xff]   ;;  %v2180_v23 = vld [vmem:[%s2566_s26 + $0x13c] ss:$12 sps:$4 sm:$0xff]  }
  0x63   : > { %968 = vmatprep.mubr.bf16.mxu1 %v2175_v12  ;;  %v2177_v22 = vld [vmem:[#allocation6 + $0x88] sm:$0xff]   ;;  %v2182_v24 = vld [vmem:[%s2566_s26 + $0x18] ss:$12 sps:$4 sm:$0xff]   ;;  %v2184_v25 = vld [vmem:[#allocation6 + $0x90] sm:$0xff]   ;;  %p2303_p8 = pneg %p2302_p6  ;;  %p2309_p0 = por %p2308_p13, %p2307_p12 }
  0x64   : > { %v2183_v26 = vld [vmem:[%s2566_s26 + $0x138] ss:$12 sps:$4 sm:$0xff]   ;;  %v2186_v28 = vld [vmem:[%s2566_s26 + $0x34] ss:$12 sps:$4 sm:$0xff]   ;;  %v2190_v31 = vld [vmem:[%s2566_s26 + $0x30] ss:$12 sps:$4 sm:$0xff]  }
  0x65   : > { %1877 = vmatpush3.bf16.msra.mxu0 %v2159_v5  ;;  %2066 = vmatpush3.bf16.msra.mxu1 %v2159_v5  ;;  %v2185_v27 = vld [vmem:[#allocation6 + $0x98] sm:$0xff]   ;;  %v2188_v29 = vld [vmem:[%s2566_s26 + $0x154] ss:$12 sps:$4 sm:$0xff]   ;;  %v2193_v33 = vld [vmem:[#allocation6 + $0xa8] sm:$0xff]   ;;  %p2310_p5 = pnand %p2309_p0, %p2303_p8 }
  0x66   : > { %1878 = vmatprep.subr.bf16.mxu0 %v2160_v6  ;;  %2059 = vmatprep.subr.bf16.mxu1 %v2160_v6  ;;  %v2192_v30 = vld [vmem:[#allocation6 + $0xa0] sm:$0xff]   ;;  %v2191_v32 = vld [vmem:[%s2566_s26 + $0x150] ss:$12 sps:$4 sm:$0xff]   ;;  %v2194_v34 = vld [vmem:[%s2566_s26 + $0x4c] ss:$12 sps:$4 sm:$0xff]  }
  0x67   : > { %v2196_v35 = vld [vmem:[%s2566_s26 + $0x16c] ss:$12 sps:$4 sm:$0xff]   ;;  %v2200_v36 = vld [vmem:[#allocation6 + $0xb0] sm:$0xff]   ;;  %v2207_v44 = vld [vmem:[%s2566_s26 + $0x7c] ss:$12 sps:$4 sm:$0xff]  }
  0x68   : > { %v2198_v37 = vld [vmem:[%s2566_s26 + $0x48] ss:$12 sps:$4 sm:$0xff]   ;;  %v2202_v39 = vld [vmem:[%s2566_s26 + $0x64] ss:$12 sps:$4 sm:$0xff]   ;;  %v2201_v40 = vld [vmem:[#allocation6 + $0xb8] sm:$0xff]  }
  0x69   : > { %1879 = vmatpush3.bf16.msra.mxu0 %v2161_v7  ;;  %2067 = vmatpush3.bf16.msra.mxu1 %v2161_v7  ;;  %v2199_v38 = vld [vmem:[%s2566_s26 + $0x168] ss:$12 sps:$4 sm:$0xff]   ;;  %v2205_v42 = vld [vmem:[%s2566_s26 + $0x60] ss:$12 sps:$4 sm:$0xff]   ;;  %v2209_v45 = vld [vmem:[%s2566_s26 + $0x38] ss:$12 sps:$4 sm:$0xff]  }
  0x6a   : > { %1880 = vmatprep.subr.bf16.mxu0 %v2162_v8  ;;  %2060 = vmatprep.subr.bf16.mxu1 %v2162_v8  ;;  %v2204_v41 = vld [vmem:[%s2566_s26 + $0x8] ss:$12 sps:$4 sm:$0xff]   ;;  %v2206_v43 = vld [vmem:[%s2566_s26 + $0x20] ss:$12 sps:$4 sm:$0xff]   ;;  %v2210_v46 = vld [vmem:[%s2566_s26 + $0x78] ss:$12 sps:$4 sm:$0xff]  }
  0x6b   : > { %v2211_v47 = vld [vmem:[%s2566_s26 + $0x50] ss:$12 sps:$4 sm:$0xff]   ;;  %v2212_v48 = vld [vmem:[%s2566_s26 + $0x94] ss:$12 sps:$4 sm:$0xff]   ;;  %v2217_v52 = vld [vmem:[%s2566_s26 + $0xac] ss:$12 sps:$4 sm:$0xff]  }
  0x6c   : > { %v2214_v49 = vld [vmem:[%s2566_s26 + $0x68] ss:$12 sps:$4 sm:$0xff]   ;;  %v2215_v50 = vld [vmem:[%s2566_s26 + $0x90] ss:$12 sps:$4 sm:$0xff]   ;;  %v2216_v51 = vld [vmem:[%s2566_s26 + $0x80] ss:$12 sps:$4 sm:$0xff]  }
  0x6d   : > { %1881 = vmatpush3.bf16.msra.mxu0 %v2163_v9  ;;  %2068 = vmatpush3.bf16.msra.mxu1 %v2163_v9  ;;  %v2219_v53 = vld [vmem:[%s2566_s26 + $0x98] ss:$12 sps:$4 sm:$0xff]   ;;  %v2220_v54 = vld [vmem:[%s2566_s26 + $0xa8] ss:$12 sps:$4 sm:$0xff]   ;;  %v2221_v55 = vld [vmem:[%s2566_s26 + $0xb0] ss:$12 sps:$4 sm:$0xff]  }
  0x6e   : > { %1882 = vmatprep.subr.bf16.mxu0 %v2164_v10  ;;  %2061 = vmatprep.subr.bf16.mxu1 %v2164_v10  ;;  %v2222_v56 = vld [vmem:[%s2566_s26 + $0xc4] ss:$12 sps:$4 sm:$0xff]   ;;  %v2224_v57 = vld [vmem:[%s2566_s26 + $0xc8] ss:$12 sps:$4 sm:$0xff]   ;;  %v2225_v58 = vld [vmem:[%s2566_s26 + $0xc0] ss:$12 sps:$4 sm:$0xff]  }
  0x6f   : > { %v2226_v59 = vld [vmem:[%s2566_s26 + $0xe0] ss:$12 sps:$4 sm:$0xff]   ;;  %v2227_v60 = vld [vmem:[%s2566_s26 + $0xdc] ss:$12 sps:$4 sm:$0xff]   ;;  %v2229_v61 = vld [vmem:[%s2566_s26 + $0xf8] ss:$12 sps:$4 sm:$0xff]  }
  0x70   : > { %v2230_v62 = vld [vmem:[%s2566_s26 + $0xd8] ss:$12 sps:$4 sm:$0xff]   ;;  %v2231_v63 = vld [vmem:[%s2566_s26 + $0x110] ss:$12 sps:$4 sm:$0xff]   ;;  %v2232_v0 = vld [vmem:[%s2566_s26 + $0xf4] ss:$12 sps:$4 sm:$0xff]  }
  0x71   : > { %1883 = vmatpush3.bf16.msra.mxu0 %v2165_v13  ;;  %2069 = vmatpush3.bf16.msra.mxu1 %v2165_v13  ;;  %v2234_v1 = vld [vmem:[%s2566_s26 + $0x128] ss:$12 sps:$4 sm:$0xff]   ;;  %v2235_v2 = vld [vmem:[%s2566_s26 + $0xf0] ss:$12 sps:$4 sm:$0xff]   ;;  %v2236_v3 = vld [vmem:[%s2566_s26 + $0x140] ss:$12 sps:$4 sm:$0xff]  }
  0x72   : > { %1884 = vmatprep.subr.bf16.mxu0 %v2166_v14  ;;  %2062 = vmatprep.subr.bf16.mxu1 %v2166_v14  ;;  %v2237_v4 = vld [vmem:[%s2566_s26 + $0x10c] ss:$12 sps:$4 sm:$0xff]   ;;  %v2240_v6 = vld [vmem:[%s2566_s26 + $0x108] ss:$12 sps:$4 sm:$0xff]   ;;  %v2241_v7 = vld [vmem:[%s2566_s26 + $0x170] ss:$12 sps:$4 sm:$0xff]  }
  0x73   : > { %v2239_v5 = vld [vmem:[%s2566_s26 + $0x158] ss:$12 sps:$4 sm:$0xff]  }
  0x75   : > { %1885 = vmatpush3.bf16.msra.mxu0 %v2167_v15  ;;  %2070 = vmatpush3.bf16.msra.mxu1 %v2167_v15 }
  0x76   : > { %1886 = vmatprep.subr.bf16.mxu0 %v2168_v16  ;;  %2063 = vmatprep.subr.bf16.mxu1 %v2168_v16 }
  0x79   : > { %1887 = vmatpush3.bf16.msra.mxu0 %v2169_v17  ;;  %2071 = vmatpush3.bf16.msra.mxu1 %v2169_v17 }
  0x7a   : > { %2008 = vmatprep.subr.bf16.mxu1 %v2176_v18 }
  0x7c   : > { %873 = vmatmul.mubr.bf16.vlgmr.msra.gmra.mrb[0].mxu0 %v2170_v19  ;;  %969 = vmatmul.mubr.bf16.vlgmr.msra.gmra.mrb[0].mxu1 %v2173_v20 }
  0x7d   : > { %2009 = vmatpush3.bf16.msra.mxu1 %v2176_v18  ;;  %880 = vmatprep.mubr.bf16.mxu0 %v2178_v21 }
  0x7e   : > { %2010 = vmatprep.subr.bf16.mxu1 %v2177_v22  ;;  %976 = vmatprep.mubr.bf16.mxu1 %v2180_v23 }
  0x81   : > { %2011 = vmatpush3.bf16.msra.mxu1 %v2177_v22 }
  0x82   : > { %2012 = vmatprep.subr.bf16.mxu1 %v2184_v25 }
  0x84   : > { %881 = vmatmul.mubr.bf16.gmra.mrb[4].mxu0 %v2182_v24  ;;  %977 = vmatmul.mubr.bf16.gmra.mrb[4].mxu1 %v2183_v26 }
  0x85   : > { %2013 = vmatpush3.bf16.msra.mxu1 %v2184_v25  ;;  %888 = vmatprep.mubr.bf16.mxu0 %v2186_v28 }
  0x86   : > { %2014 = vmatprep.subr.bf16.mxu1 %v2185_v27  ;;  %984 = vmatprep.mubr.bf16.mxu1 %v2188_v29 }
  0x89   : > { %2015 = vmatpush3.bf16.msra.mxu1 %v2185_v27 }
  0x8a   : > { %2016 = vmatprep.subr.bf16.mxu1 %v2192_v30 }
  0x8c   : > { %889 = vmatmul.mubr.bf16.gmra.mrb[8].mxu0 %v2190_v31  ;;  %985 = vmatmul.mubr.bf16.gmra.mrb[8].mxu1 %v2191_v32 }
  0x8d   : > { %2017 = vmatpush3.bf16.msra.mxu1 %v2192_v30  ;;  %896 = vmatprep.mubr.bf16.mxu0 %v2194_v34 }
  0x8e   : > { %2018 = vmatprep.subr.bf16.mxu1 %v2193_v33  ;;  %992 = vmatprep.mubr.bf16.mxu1 %v2196_v35 }
  0x91   : > { %2019 = vmatpush3.bf16.msra.mxu1 %v2193_v33 }
  0x92   : > { %2020 = vmatprep.subr.bf16.mxu1 %v2200_v36 }
  0x94   : > { %897 = vmatmul.mubr.bf16.gmra.mrb[12].mxu0 %v2198_v37  ;;  %993 = vmatmul.mubr.bf16.gmra.mrb[12].mxu1 %v2199_v38 }
  0x95   : > { %2021 = vmatpush3.bf16.msra.mxu1 %v2200_v36  ;;  %904 = vmatprep.mubr.bf16.mxu0 %v2202_v39 }
  0x96   : > { %2022 = vmatprep.subr.bf16.mxu1 %v2201_v40  ;;  %2024 = vmatprep.mubr.bf16.mxu1 %v2204_v41 }
  0x99   : > { %2023 = vmatpush3.bf16.msra.mxu1 %v2201_v40 }
  0x9c   : > { %905 = vmatmul.mubr.bf16.gmra.mrb[16].mxu0 %v2205_v42  ;;  %2025 = vmatmul.mubr.bf16.vlgmr.msra.gmra.mrb[16].mxu1 %v2206_v43 }
  0x9d   : > { %912 = vmatprep.mubr.bf16.mxu0 %v2207_v44  ;;  %2028 = vmatprep.mubr.bf16.mxu1 %v2209_v45 }
  0xa4   : > { %913 = vmatmul.mubr.bf16.gmra.mrb[20].mxu0 %v2210_v46  ;;  %2029 = vmatmul.mubr.bf16.gmra.mrb[20].mxu1 %v2211_v47 }
  0xa5   : > { %920 = vmatprep.mubr.bf16.mxu0 %v2212_v48  ;;  %2032 = vmatprep.mubr.bf16.mxu1 %v2214_v49 }
  0xac   : > { %921 = vmatmul.mubr.bf16.gmra.mrb[24].mxu0 %v2215_v50  ;;  %2033 = vmatmul.mubr.bf16.gmra.mrb[24].mxu1 %v2216_v51 }
  0xad   : > { %928 = vmatprep.mubr.bf16.mxu0 %v2217_v52  ;;  %2036 = vmatprep.mubr.bf16.mxu1 %v2219_v53 }
  0xb4   : > { %929 = vmatmul.mubr.bf16.gmra.mrb[28].mxu0 %v2220_v54  ;;  %2037 = vmatmul.mubr.bf16.gmra.mrb[28].mxu1 %v2221_v55 }
  0xb5   : > { %936 = vmatprep.mubr.bf16.mxu0 %v2222_v56  ;;  %2040 = vmatprep.mubr.bf16.mxu1 %v2224_v57 }
  0xbc   : > { %937 = vmatmul.mubr.bf16.gmra.mrb[32].mxu0 %v2225_v58  ;;  %2041 = vmatmul.mubr.bf16.gmra.mrb[32].mxu1 %v2226_v59  ;;  %v2643_v58 = vld [vmem:[%s2767_s2] ss:$0 sm:$0xff] }
  0xbd   : > { %944 = vmatprep.mubr.bf16.mxu0 %v2227_v60  ;;  %2044 = vmatprep.mubr.bf16.mxu1 %v2229_v61 }
  0xc4   : > { %945 = vmatmul.mubr.bf16.gmra.mrb[36].mxu0 %v2230_v62  ;;  %2045 = vmatmul.mubr.bf16.gmra.mrb[36].mxu1 %v2231_v63 }
  0xc5   : > { %952 = vmatprep.mubr.bf16.mxu0 %v2232_v0  ;;  %2048 = vmatprep.mubr.bf16.mxu1 %v2234_v1 }
  0xcc   : > { %953 = vmatmul.mubr.bf16.gmra.mrb[40].mxu0 %v2235_v2  ;;  %2049 = vmatmul.mubr.bf16.gmra.mrb[40].mxu1 %v2236_v3 }
  0xcd   : > { %960 = vmatprep.mubr.bf16.mxu0 %v2237_v4  ;;  %2052 = vmatprep.mubr.bf16.mxu1 %v2239_v5 }
  0xd4   : > { %961 = vmatmul.mubr.bf16.gmra.mrb[44].mxu0 %v2240_v6  ;;  %2053 = vmatmul.mubr.bf16.gmra.mrb[44].mxu1 %v2241_v7 }
 0x14f   : > { %v1888_v8 = vpop.f32.mrb[0].mxu0  ;;  %v1960_v9 = vpop.f32.mrb[0].mxu1 }
 0x150   : > { %v1889_v10 = vpop.f32.mrb[1].mxu0  ;;  %v1961_v11 = vpop.f32.mrb[1].mxu1 }
 0x151   : > { %v1890_v12 = vadd.f32 %v1889_v10, %v1888_v8  ;;  %v2624_v13 = vadd.f32 %v1961_v11, %v1960_v9  ;;  %v1891_v14 = vpop.f32.mrb[2].mxu0  ;;  %v1963_v15 = vpop.f32.mrb[2].mxu1 }
 0x152   : > { %v1892_v16 = vpop.f32.mrb[3].mxu0  ;;  %v1964_v17 = vpop.f32.mrb[3].mxu1 }
 0x153   : > { %v1893_v18 = vadd.f32 %v1892_v16, %v1891_v14  ;;  %v2626_v19 = vadd.f32 %v1964_v17, %v1963_v15 }
 0x157   : > { %v1894_v20 = vpop.f32.mrb[4].mxu0  ;;  %v1966_v21 = vpop.f32.mrb[4].mxu1 }
 0x158   : > { %v1895_v22 = vpop.f32.mrb[5].mxu0  ;;  %v1967_v23 = vpop.f32.mrb[5].mxu1 }
 0x159   : > { %v1896_v24 = vadd.f32 %v1895_v22, %v1894_v20  ;;  %v2628_v25 = vadd.f32 %v1967_v23, %v1966_v21  ;;  %v1897_v26 = vpop.f32.mrb[6].mxu0  ;;  %v1969_v27 = vpop.f32.mrb[6].mxu1 }
 0x15a   : > { %v1898_v28 = vpop.f32.mrb[7].mxu0  ;;  %v1970_v29 = vpop.f32.mrb[7].mxu1 }
 0x15b   : > { %v1899_v30 = vadd.f32 %v1898_v28, %v1897_v26  ;;  %v2630_v31 = vadd.f32 %v1970_v29, %v1969_v27 }
 0x15f   : > { %v1900_v32 = vpop.f32.mrb[8].mxu0  ;;  %v1972_v33 = vpop.f32.mrb[8].mxu1 }
 0x160   : > { %v1901_v34 = vpop.f32.mrb[9].mxu0  ;;  %v1973_v35 = vpop.f32.mrb[9].mxu1 }
 0x161   : > { %v1902_v36 = vadd.f32 %v1901_v34, %v1900_v32  ;;  %v2632_v37 = vadd.f32 %v1973_v35, %v1972_v33  ;;  %v1903_v38 = vpop.f32.mrb[10].mxu0  ;;  %v1975_v39 = vpop.f32.mrb[10].mxu1 }
 0x162   : > { %v1904_v40 = vpop.f32.mrb[11].mxu0  ;;  %v1976_v41 = vpop.f32.mrb[11].mxu1 }
 0x163   : > { %v1905_v42 = vadd.f32 %v1904_v40, %v1903_v38  ;;  %v2634_v43 = vadd.f32 %v1976_v41, %v1975_v39 }
 0x167   : > { %v1906_v44 = vpop.f32.mrb[12].mxu0  ;;  %v1978_v45 = vpop.f32.mrb[12].mxu1 }
 0x168   : > { %v1907_v46 = vpop.f32.mrb[13].mxu0  ;;  %v1979_v47 = vpop.f32.mrb[13].mxu1 }
 0x169   : > { %v1908_v48 = vadd.f32 %v1907_v46, %v1906_v44  ;;  %v2636_v49 = vadd.f32 %v1979_v47, %v1978_v45  ;;  %v1909_v50 = vpop.f32.mrb[14].mxu0  ;;  %v1981_v51 = vpop.f32.mrb[14].mxu1 }
 0x16a   : > { %v1910_v52 = vpop.f32.mrb[15].mxu0  ;;  %v1982_v53 = vpop.f32.mrb[15].mxu1 }
 0x16b   : > { %v1911_v54 = vadd.f32 %v1910_v52, %v1909_v50  ;;  %v2638_v55 = vadd.f32 %v1982_v53, %v1981_v51 }
 0x16f   : > { %v1912_v56 = vpop.f32.mrb[16].mxu0  ;;  %v2026_v57 = vpop.f32.mrb[16].mxu1 }
 0x170   : > { %v1044_v59 = vadd.f32 %v2026_v57, %v1896_v24  ;;  %v1913_v60 = vpop.f32.mrb[17].mxu0  ;;  %v1035_v61 = vpop.f32.mrb[17].mxu1 }
 0x171   : > { %v1914_v62 = vadd.f32 %v1913_v60, %v1912_v56  ;;  %v1036_v63 = vadd.f32 %v1890_v12, %v1035_v61  ;;  %v1915_v0 = vpop.f32.mrb[18].mxu0  ;;  %v2027_v1 = vpop.f32.mrb[18].mxu1 }
 0x172   : > { %v1270_v2 = vadd.f32 %v2643_v58, %v1044_v59  ;;  %v1047_v3 = vadd.f32 %v2027_v1, %v1899_v30  ;;  %v1916_v4 = vpop.f32.mrb[19].mxu0  ;;  %v1038_v5 = vpop.f32.mrb[19].mxu1 }
 0x173   : > { %v1268_v6 = vadd.f32 %v2643_v58, %v1036_v63  ;;  %v1917_v7 = vadd.f32 %v1916_v4, %v1915_v0  ;;  %v1039_v8 = vadd.f32 %v1893_v18, %v1038_v5 }
 0x174   : > { %v1271_v9 = vadd.f32 %v2643_v58, %v1047_v3  ;;  %v1302_v11 = vmax.f32 %v1270_v2, 0.0 }
 0x175   : > { %v1269_v10 = vadd.f32 %v2643_v58, %v1039_v8  ;;  %v1300_v15 = vmax.f32 %v1268_v6, 0.0 }
 0x176   : > { %v1303_v14 = vmax.f32 %v1271_v9, 0.0 }
 0x177   : > { %v1301_v12 = vmax.f32 %v1269_v10, 0.0  ;;  %v1918_v16 = vpop.f32.mrb[20].mxu0  ;;  %v2030_v17 = vpop.f32.mrb[20].mxu1 }
 0x178   : > { %v1785_v20 = vpack.c.bf16 %v1303_v14, %v1302_v11  ;;  %v1060_v21 = vadd.f32 %v2030_v17, %v1908_v48  ;;  %v1919_v22 = vpop.f32.mrb[21].mxu0  ;;  %v1051_v23 = vpop.f32.mrb[21].mxu1 }
 0x179   : > { %v1780_v24 = vpack.c.bf16 %v1301_v12, %v1300_v15  ;;  %v1920_v26 = vadd.f32 %v1919_v22, %v1918_v16  ;;  %v1052_v27 = vadd.f32 %v1902_v36, %v1051_v23  ;;  %v1921_v28 = vpop.f32.mrb[22].mxu0  ;;  %v2031_v18 = vpop.f32.mrb[22].mxu1 }
 0x17a   : > { %1857 = vst [vmem:[%s2650_s7 + $0x8] sm:$0xff] %v1785_v20   ;;  %v1274_v29 = vadd.f32 %v2643_v58, %v1060_v21  ;;  %v1063_v30 = vadd.f32 %v2031_v18, %v1911_v54  ;;  %v1922_v32 = vpop.f32.mrb[23].mxu0  ;;  %v1054_v33 = vpop.f32.mrb[23].mxu1 }
 0x17b   : > { %1781 = vst [vmem:[%s2650_s7] sm:$0xff] %v1780_v24   ;;  %v1272_v34 = vadd.f32 %v2643_v58, %v1052_v27  ;;  %v1923_v35 = vadd.f32 %v1922_v32, %v1921_v28  ;;  %v1055_v38 = vadd.f32 %v1905_v42, %v1054_v33 }
 0x17c   : > { %v1275_v39 = vadd.f32 %v2643_v58, %v1063_v30  ;;  %v1306_v40 = vmax.f32 %v1274_v29, 0.0 }
 0x17d   : > { %v1273_v36 = vadd.f32 %v2643_v58, %v1055_v38  ;;  %v1304_v44 = vmax.f32 %v1272_v34, 0.0 }
 0x17e   : > { %v1307_v41 = vmax.f32 %v1275_v39, 0.0 }
 0x17f   : > { %v1305_v45 = vmax.f32 %v1273_v36, 0.0  ;;  %v1924_v46 = vpop.f32.mrb[24].mxu0  ;;  %v2034_v47 = vpop.f32.mrb[24].mxu1 }
 0x180   : > { %v1795_v48 = vpack.c.bf16 %v1307_v41, %v1306_v40  ;;  %v1076_v50 = vadd.f32 %v2034_v47, %v1920_v26  ;;  %v1925_v51 = vpop.f32.mrb[25].mxu0  ;;  %v1067_v52 = vpop.f32.mrb[25].mxu1 }
 0x181   : > { %v1790_v53 = vpack.c.bf16 %v1305_v45, %v1304_v44  ;;  %v1926_v54 = vadd.f32 %v1925_v51, %v1924_v46  ;;  %v1068_v56 = vadd.f32 %v1914_v62, %v1067_v52  ;;  %v1927_v42 = vpop.f32.mrb[26].mxu0  ;;  %v2035_v57 = vpop.f32.mrb[26].mxu1 }
 0x182   : > { %1859 = vst [vmem:[%s2650_s7 + $0x18] sm:$0xff] %v1795_v48   ;;  %v1278_v59 = vadd.f32 %v2643_v58, %v1076_v50  ;;  %v1079_v60 = vadd.f32 %v2035_v57, %v1923_v35  ;;  %v1928_v61 = vpop.f32.mrb[27].mxu0  ;;  %v1070_v63 = vpop.f32.mrb[27].mxu1 }
 0x183   : > { %1858 = vst [vmem:[%s2650_s7 + $0x10] sm:$0xff] %v1790_v53   ;;  %v1276_v0 = vadd.f32 %v2643_v58, %v1068_v56  ;;  %v1929_v1 = vadd.f32 %v1928_v61, %v1927_v42  ;;  %v1071_v2 = vadd.f32 %v1917_v7, %v1070_v63 }
 0x184   : > { %v1279_v3 = vadd.f32 %v2643_v58, %v1079_v60  ;;  %v1310_v5 = vmax.f32 %v1278_v59, 0.0 }
 0x185   : > { %v1277_v4 = vadd.f32 %v2643_v58, %v1071_v2  ;;  %v1308_v6 = vmax.f32 %v1276_v0, 0.0 }
 0x186   : > { %v1311_v62 = vmax.f32 %v1279_v3, 0.0 }
 0x187   : > { %v1309_v8 = vmax.f32 %v1277_v4, 0.0  ;;  %v1930_v9 = vpop.f32.mrb[28].mxu0  ;;  %v2038_v10 = vpop.f32.mrb[28].mxu1 }
 0x188   : > { %v1805_v11 = vpack.c.bf16 %v1311_v62, %v1310_v5  ;;  %v1931_v14 = vpop.f32.mrb[29].mxu0  ;;  %v1083_v15 = vpop.f32.mrb[29].mxu1 }
 0x189   : > { %v1800_v12 = vpack.c.bf16 %v1309_v8, %v1308_v6  ;;  %v1932_v16 = vadd.f32 %v1931_v14, %v1930_v9  ;;  %v1084_v17 = vadd.f32 %v1926_v54, %v1083_v15  ;;  %v1933_v20 = vpop.f32.mrb[30].mxu0  ;;  %v2039_v7 = vpop.f32.mrb[30].mxu1 }
 0x18a   : > { %1861 = vst [vmem:[%s2650_s7 + $0x28] sm:$0xff] %v1805_v11   ;;  %v1934_v21 = vpop.f32.mrb[31].mxu0  ;;  %v1086_v22 = vpop.f32.mrb[31].mxu1 }
 0x18b   : > { %1860 = vst [vmem:[%s2650_s7 + $0x20] sm:$0xff] %v1800_v12   ;;  %v1092_v23 = vadd.f32 %v2038_v10, %v1932_v16  ;;  %v1280_v24 = vadd.f32 %v2643_v58, %v1084_v17  ;;  %v1935_v26 = vadd.f32 %v1934_v21, %v1933_v20  ;;  %v1087_v27 = vadd.f32 %v1929_v1, %v1086_v22 }
 0x18d   : > { %v1282_v28 = vadd.f32 %v2643_v58, %v1092_v23  ;;  %v1095_v18 = vadd.f32 %v2039_v7, %v1935_v26  ;;  %v1281_v29 = vadd.f32 %v2643_v58, %v1087_v27  ;;  %v1312_v30 = vmax.f32 %v1280_v24, 0.0 }
 0x18f   : > { %v1283_v32 = vadd.f32 %v2643_v58, %v1095_v18  ;;  %v1313_v33 = vmax.f32 %v1281_v29, 0.0  ;;  %v1936_v34 = vpop.f32.mrb[32].mxu0  ;;  %v2042_v35 = vpop.f32.mrb[32].mxu1  ;;  %v1314_v36 = vmax.f32 %v1282_v28, 0.0 }
 0x190   : > { %v1937_v38 = vpop.f32.mrb[33].mxu0  ;;  %v1099_v39 = vpop.f32.mrb[33].mxu1 }
 0x191   : > { %v1315_v40 = vmax.f32 %v1283_v32, 0.0  ;;  %v1810_v41 = vpack.c.bf16 %v1313_v33, %v1312_v30  ;;  %v1938_v44 = vadd.f32 %v1937_v38, %v1936_v34  ;;  %v1939_v45 = vpop.f32.mrb[34].mxu0  ;;  %v2043_v46 = vpop.f32.mrb[34].mxu1 }
 0x192   : > { %v1940_v47 = vpop.f32.mrb[35].mxu0  ;;  %v1102_v48 = vpop.f32.mrb[35].mxu1 }
 0x193   : > { %v1815_v50 = vpack.c.bf16 %v1315_v40, %v1314_v36  ;;  %1862 = vst [vmem:[%s2650_s7 + $0x30] sm:$0xff] %v1810_v41   ;;  %v1100_v51 = vadd.f32 %v1938_v44, %v1099_v39  ;;  %v1941_v52 = vadd.f32 %v1940_v47, %v1939_v45 }
 0x195   : > { %1863 = vst [vmem:[%s2650_s7 + $0x38] sm:$0xff] %v1815_v50   ;;  %v1284_v53 = vadd.f32 %v2643_v58, %v1100_v51  ;;  %v1103_v54 = vadd.f32 %v1941_v52, %v1102_v48 }
 0x197   : > { %v1285_v56 = vadd.f32 %v2643_v58, %v1103_v54  ;;  %v1942_v42 = vpop.f32.mrb[36].mxu0  ;;  %v2674_v57 = vpop.f32.mrb[36].mxu1  ;;  %v1316_v61 = vmax.f32 %v1284_v53, 0.0 }
 0x198   : > { %v1943_v59 = vpop.f32.mrb[37].mxu0  ;;  %v1115_v60 = vpop.f32.mrb[37].mxu1 }
 0x199   : > { %v1317_v63 = vmax.f32 %v1285_v56, 0.0  ;;  %v1944_v0 = vadd.f32 %v1943_v59, %v1942_v42  ;;  %v1945_v1 = vpop.f32.mrb[38].mxu0  ;;  %v2676_v2 = vpop.f32.mrb[38].mxu1 }
 0x19a   : > { %v1946_v3 = vpop.f32.mrb[39].mxu0  ;;  %v1118_v4 = vpop.f32.mrb[39].mxu1 }
 0x19b   : > { %v1820_v5 = vpack.c.bf16 %v1317_v63, %v1316_v61  ;;  %v1108_v62 = vadd.f32 %v2042_v35, %v1944_v0  ;;  %v1947_v6 = vadd.f32 %v1946_v3, %v1945_v1 }
 0x19d   : > { %1864 = vst [vmem:[%s2650_s7 + $0x40] sm:$0xff] %v1820_v5   ;;  %v1286_v8 = vadd.f32 %v2643_v58, %v1108_v62  ;;  %v1111_v9 = vadd.f32 %v2043_v46, %v1947_v6 }
 0x19f   : > { %v1287_v10 = vadd.f32 %v2643_v58, %v1111_v9  ;;  %v1948_v11 = vpop.f32.mrb[40].mxu0  ;;  %v2050_v14 = vpop.f32.mrb[40].mxu1  ;;  %v1318_v17 = vmax.f32 %v1286_v8, 0.0 }
 0x1a0   : > { %v1140_v15 = vadd.f32 %v2050_v14, %v2628_v25  ;;  %v1949_v12 = vpop.f32.mrb[41].mxu0  ;;  %v1131_v16 = vpop.f32.mrb[41].mxu1 }
 0x1a1   : > { %v1319_v20 = vmax.f32 %v1287_v10, 0.0  ;;  %v1950_v7 = vadd.f32 %v1949_v12, %v1948_v11  ;;  %v1132_v21 = vadd.f32 %v2624_v13, %v1131_v16  ;;  %v1951_v22 = vpop.f32.mrb[42].mxu0  ;;  %v2051_v23 = vpop.f32.mrb[42].mxu1 }
 0x1a2   : > { %v1294_v24 = vadd.f32 %v2643_v58, %v1140_v15  ;;  %v1143_v26 = vadd.f32 %v2051_v23, %v2630_v31  ;;  %v1952_v27 = vpop.f32.mrb[43].mxu0  ;;  %v1134_v28 = vpop.f32.mrb[43].mxu1 }
 0x1a3   : > { %v1825_v18 = vpack.c.bf16 %v1319_v20, %v1318_v17  ;;  %v1116_v29 = vadd.f32 %v1950_v7, %v1115_v60  ;;  %v1953_v30 = vadd.f32 %v1952_v27, %v1951_v22  ;;  %v1292_v25 = vadd.f32 %v2643_v58, %v1132_v21 }
 0x1a4   : > { %v1295_v32 = vadd.f32 %v2643_v58, %v1143_v26  ;;  %v1135_v33 = vadd.f32 %v2626_v19, %v1134_v28  ;;  %v1326_v35 = vmax.f32 %v1294_v24, 0.0 }
 0x1a5   : > { %1865 = vst [vmem:[%s2650_s7 + $0x48] sm:$0xff] %v1825_v18   ;;  %v1288_v13 = vadd.f32 %v2643_v58, %v1116_v29  ;;  %v1119_v34 = vadd.f32 %v1953_v30, %v1118_v4  ;;  %v1324_v41 = vmax.f32 %v1292_v25, 0.0 }
 0x1a6   : > { %v1327_v38 = vmax.f32 %v1295_v32, 0.0  ;;  %v1293_v39 = vadd.f32 %v2643_v58, %v1135_v33 }
 0x1a7   : > { %v1289_v31 = vadd.f32 %v2643_v58, %v1119_v34  ;;  %v1954_v36 = vpop.f32.mrb[44].mxu0  ;;  %v2054_v40 = vpop.f32.mrb[44].mxu1  ;;  %v1320_v48 = vmax.f32 %v1288_v13, 0.0 }
 0x1a8   : > { %v1845_v44 = vpack.c.bf16 %v1327_v38, %v1326_v35  ;;  %v1325_v45 = vmax.f32 %v1293_v39, 0.0  ;;  %v1156_v46 = vadd.f32 %v2054_v40, %v2636_v49  ;;  %v1955_v47 = vpop.f32.mrb[45].mxu0  ;;  %v1147_v19 = vpop.f32.mrb[45].mxu1 }
 0x1a9   : > { %v1321_v50 = vmax.f32 %v1289_v31, 0.0  ;;  %v1956_v51 = vadd.f32 %v1955_v47, %v1954_v36  ;;  %v1148_v52 = vadd.f32 %v2632_v37, %v1147_v19  ;;  %v1957_v53 = vpop.f32.mrb[46].mxu0  ;;  %v2055_v54 = vpop.f32.mrb[46].mxu1 }
 0x1aa   : > { %1869 = vst [vmem:[%s2650_s7 + $0x68] sm:$0xff] %v1845_v44   ;;  %v1840_v56 = vpack.c.bf16 %v1325_v45, %v1324_v41  ;;  %v1298_v42 = vadd.f32 %v2643_v58, %v1156_v46  ;;  %v1159_v59 = vadd.f32 %v2055_v54, %v2638_v55  ;;  %v1958_v60 = vpop.f32.mrb[47].mxu0  ;;  %v1150_v49 = vpop.f32.mrb[47].mxu1 }
 0x1ab   : > { %v1830_v61 = vpack.c.bf16 %v1321_v50, %v1320_v48  ;;  %v1124_v63 = vadd.f32 %v2674_v57, %v1956_v51  ;;  %v1959_v0 = vadd.f32 %v1958_v60, %v1957_v53  ;;  %v1296_v37 = vadd.f32 %v2643_v58, %v1148_v52 }
 0x1ac   : > { %1868 = vst [vmem:[%s2650_s7 + $0x60] sm:$0xff] %v1840_v56   ;;  %v1299_v1 = vadd.f32 %v2643_v58, %v1159_v59  ;;  %v1151_v3 = vadd.f32 %v2634_v43, %v1150_v49  ;;  %v1330_v5 = vmax.f32 %v1298_v42, 0.0 }
 0x1ad   : > { %1866 = vst [vmem:[%s2650_s7 + $0x50] sm:$0xff] %v1830_v61   ;;  %v1290_v4 = vadd.f32 %v2643_v58, %v1124_v63  ;;  %v1127_v55 = vadd.f32 %v2676_v2, %v1959_v0  ;;  %v1328_v8 = vmax.f32 %v1296_v37, 0.0 }
 0x1ae   : > { %v1331_v62 = vmax.f32 %v1299_v1, 0.0  ;;  %v1297_v57 = vadd.f32 %v2643_v58, %v1151_v3 }
 0x1af   : > { %v1291_v6 = vadd.f32 %v2643_v58, %v1127_v55  ;;  %v1322_v10 = vmax.f32 %v1290_v4, 0.0 }
 0x1b0   : > { %v1855_v9 = vpack.c.bf16 %v1331_v62, %v1330_v5  ;;  %v1329_v43 = vmax.f32 %v1297_v57, 0.0 }
 0x1b1   : > { %v1323_v11 = vmax.f32 %v1291_v6, 0.0 }
 0x1b2   : > { %1871 = vst [vmem:[%s2650_s7 + $0x78] sm:$0xff] %v1855_v9   ;;  %v1850_v14 = vpack.c.bf16 %v1329_v43, %v1328_v8 }
 0x1b3   : > { %v1835_v58 = vpack.c.bf16 %v1323_v11, %v1322_v10 }
 0x1b4   : > { %1870 = vst [vmem:[%s2650_s7 + $0x70] sm:$0xff] %v1850_v14  }
 0x1b5   : > { %1867 = vst [vmem:[%s2650_s7 + $0x58] sm:$0xff] %v1835_v58  }
 0x1b6   : > { %2313 = shalt.err (!%p2310_p5)
}
 0x1b7   : > { %s2314_s30 = scalar_lea.hbm %s2713_s6, 2048  ;;  %s2318_s20 = scalar_lea.hbm %s2768_s3, 8192 }
 0x1b8   : > { %p2315_p9 = scmp.ne.s32.totalorder %s2713_s6, %s2314_s30  ;;  %p2319_p3 = scmp.lt.u32.totalorder %s2713_s6, %s2768_s3 }
 0x1b9   : > { %p2320_p7 = scmp.lt.u32.totalorder %s2318_s20, %s2314_s30  ;;  %p2322_p4 = scmp.lt.u32.totalorder %s2314_s30, %s2713_s6 }
 0x1ba   : > { %p2316_p1 = pnand %p2315_p9, %p2508_p11 }
 0x1bb   : > { %p2321_p10 = por %p2320_p7, %p2319_p3 }
 0x1bc   : > { %p2317_p2 = pneg %p2316_p1 }
 0x1bd   : > { %p2323_p6 = por %p2322_p4, %p2321_p10 }
 0x1bf   : > { %p2324_p8 = pnand %p2323_p6, %p2317_p2 }
 0x1c1   : > { %2327 = shalt.err (!%p2324_p8)
}
 0x1c2   : > { %s2395_s7 = smov 64   ;;  %s2396_s8 = smov 4  }
 0x1c3   : > { %2081 = dma.vmem_to_hbm [thread:$0]  (%p2508_p11), %s2715_s10, 2048, %s2713_s6, %s1493_s15, %s2395_s7, %s2395_s7, %s2396_s8  }
 0x1c4 PF: > { %p2098_p12 = scmp.ge.s32.totalorder %s2386_s17, 2  ;;  %s1522_s11 = sand.u32 1, %s2366_s12  }
 0x1c5   : > { %p2785_p13 = scmp.ne.s32.totalorder %s2776_s23, 0  ;;  %s1523_s27 = scalar_lea.sflag [#allocation5], %s1522_s11 }
 0x1c7   : > { %p2092_p0 = pnand %p2098_p12, %p2785_p13 }
 0x1c9   : > { %2361 = dma.done.wait (!%p2092_p0), %s1523_s27, 2048  }
 0x1ca   : > { %2363 = vsyncadd (!%p2092_p0), %s1523_s27, 4294965248  ;;  %s20_s17 = sadd.s32 1, %s2386_s17   ;;  %s2786_s12 = smov %s2370_s13 }
 0x1cb   : > { %p17_p5 = scmp.ge.s32.totalorder %s20_s17, 6   ;;  %s2787_s13 = smov %s2374_s14 }
 0x1cc   : > { %s2788_s14 = smov %s2517_s5  ;;  %s2789_s15 = smov %s2382_s16 }
 0x1cd   : > { %s2790_s16 = smov %s2792_s28  ;;  %19 = sbr.rel (!%p17_p5) target bundleno = 7 (0x7), region = 93 }
 0x1d4   :  { %1528 = vsyncpa [#allocation4], 1 }
 0x1d5   :  { %1530 = vsyncpa [#allocation4 + $0x1], 1 }
 0x1d6   :  { %1531 = vsyncpa [#allocation7], 1 }
 0x1d7   :  { %1532 = vsyncpa [#allocation5], 1 }
 0x1d8   :  { %1534 = vsyncpa [#allocation5 + $0x1], 1 }

</bundles_post_ra>
